<compile_context>
chip_gen: v6e
topology: v6e:2x2x1
jax: 0.10.0
libtpu: 0.0.40
codegen_flags: <defaults>
</compile_context>

<pallas_src>
import math
import functools

import jax
import jax.numpy as jnp
from jax.experimental import pallas as pl
from jax.experimental.pallas import tpu as pltpu


_INV_SQRT2 = 1.0 / math.sqrt(2.0)


def _gelu_exact_f32(x):
    # Exact GELU: 0.5 * x * (1 + erf(x / sqrt(2)))  (matches torch.nn.GELU()).
    return 0.5 * x * (1.0 + jax.lax.erf(x * _INV_SQRT2))


def mlp_kernel(x_ref, w1_ref, b1_ref, w2_ref, b2_ref, o_ref, *scratch,
               tk, n_chunks):
    # x_ref:  (TM, E) row tile of flattened tokens
    # w1_ref: (E, M), b1_ref: (1, M)
    # w2_ref: (M, E), b2_ref: (1, E)
    # scratch: optionally one (TM, E) f32 VMEM accumulator (when n_chunks > 1).
    x = x_ref[...]
    b2 = b2_ref[...].astype(jnp.float32)

    if n_chunks == 1:
        # Small hidden dim: single fused pass, no scratch needed.
        h = jnp.dot(x, w1_ref[...], preferred_element_type=jnp.float32)
        h = _gelu_exact_f32(h + b1_ref[...].astype(jnp.float32))
        # TODO(synk): train-mode Dropout(0.1) omitted (identity in eval mode).
        y = jnp.dot(h.astype(w2_ref.dtype), w2_ref[...],
                    preferred_element_type=jnp.float32)
        # TODO(synk): second train-mode Dropout(0.1) omitted (identity in eval).
        o_ref[...] = (y + b2).astype(o_ref.dtype)
        return

    acc_ref, = scratch
    acc_ref[...] = jnp.zeros_like(acc_ref)

    def chunk_step(w1c, b1c, w2c):
        h = jnp.dot(x, w1c, preferred_element_type=jnp.float32)
        h = _gelu_exact_f32(h + b1c.astype(jnp.float32))
        # TODO(synk): train-mode Dropout(0.1) omitted (identity in eval mode).
        acc_ref[...] += jnp.dot(h.astype(w2c.dtype), w2c,
                                preferred_element_type=jnp.float32)

    if n_chunks <= 8:
        # Static unroll with static slices (zero-cost ref views).
        for c in range(n_chunks):
            sl = slice(c * tk, (c + 1) * tk)
            chunk_step(w1_ref[:, sl], b1_ref[:, sl], w2_ref[sl, :])
    else:
        @pl.loop(0, n_chunks)
        def _(c):
            off = pl.multiple_of(c * tk, tk)
            chunk_step(w1_ref[:, pl.ds(off, tk)],
                       b1_ref[:, pl.ds(off, tk)],
                       w2_ref[pl.ds(off, tk), :])

    o_ref[...] = (acc_ref[...] + b2).astype(o_ref.dtype)


def _sublane(dtype):
    # Sublane packing for the second-to-last dim: 8 f32, 16 bf16, 32 int8/fp8.
    return max(8, 32 // jnp.dtype(dtype).itemsize)


def _pick_hidden_chunk(M, target=512):
    """Chunk size along the hidden dim; must divide M."""
    if M <= target:
        return M
    for c in (target, 384, 256, 128):
        if M % c == 0:
            return c
    return M


@functools.lru_cache(maxsize=None)
def _vmem_limit_bytes():
    # ~15% headroom under the physical per-TC VMEM (v7x: 64 MiB; v5e/v6e: 128).
    cap = None
    try:
        cap = getattr(pltpu.get_tpu_info(), "vmem_capacity_bytes", None)
    except Exception:
        cap = None
    if not cap:
        return 48 * 1024 * 1024  # safe on every generation
    return int(cap * 0.85)


def _resident_spec(block_shape):
    """Whole-array resident operand; single-buffered (constant index_map)."""
    index_map = lambda i: (0,) * len(block_shape)
    buffered = getattr(pl, "Buffered", None)
    if buffered is not None:
        try:
            return pl.BlockSpec(block_shape, index_map,
                                pipeline_mode=buffered(1))
        except TypeError:  # older JAX without pipeline_mode
            pass
    return pl.BlockSpec(block_shape, index_map)


def _nbytes(a):
    return int(a.size) * jnp.dtype(a.dtype).itemsize


@functools.partial(jax.jit, static_argnames=("row_tile", "hidden_chunk"))
def mlp_forward(x, w1, b1, w2, b2, *, row_tile=256, hidden_chunk=512):
    """x: [B, S, E]  -> [B, S, E]."""
    B, S, E = x.shape
    M = w1.shape[1]
    rows = B * S

    sub = _sublane(x.dtype)
    # Row tile: multiple of the sublane packing, capped at padded row count.
    tile = min(int(row_tile), pl.cdiv(rows, sub) * sub)
    tile = max(sub, pl.cdiv(tile, sub) * sub)
    # Guarantee >= 2 grid steps whenever there is enough work so the
    # "parallel" row axis can shard across v7x's two TensorCores.
    if pl.cdiv(rows, tile) < 2 and rows > sub:
        tile = max(sub, pl.cdiv(pl.cdiv(rows, 2), sub) * sub)
    rows_p = pl.cdiv(rows, tile) * tile

    tk = _pick_hidden_chunk(M, int(hidden_chunk))
    n_chunks = M // tk

    x2d = x.reshape(rows, E)
    if rows_p != rows:  # ragged B*S (e.g. 197 ViT tokens): zero-pad rows
        x2d = jnp.pad(x2d, ((0, rows_p - rows), (0, 0)))
    b1_2d = b1.reshape(1, M)
    b2_2d = b2.reshape(1, E)

    grid = (rows_p // tile,)

    cost = pl.CostEstimate(
        flops=4 * rows_p * E * M,             # two matmuls: 2*rows*E*M each
        transcendentals=rows_p * M,           # one erf per hidden element
        bytes_accessed=(_nbytes(x2d) + _nbytes(w1) + _nbytes(b1)
                        + _nbytes(w2) + _nbytes(b2)
                        + rows_p * E * jnp.dtype(x.dtype).itemsize),
    )

    scratch_shapes = []
    if n_chunks > 1:
        scratch_shapes = [pltpu.VMEM((tile, E), jnp.float32)]

    kernel = functools.partial(mlp_kernel, tk=tk, n_chunks=n_chunks)

    out2d = pl.pallas_call(
        kernel,
        out_shape=jax.ShapeDtypeStruct((rows_p, E), x.dtype),
        grid_spec=pltpu.PrefetchScalarGridSpec(
            num_scalar_prefetch=0,
            grid=grid,
            in_specs=[
                pl.BlockSpec((tile, E), lambda i: (i, 0)),   # x row tile
                _resident_spec((E, M)),                      # W1 (resident, 1-buf)
                _resident_spec((1, M)),                      # b1
                _resident_spec((M, E)),                      # W2 (resident, 1-buf)
                _resident_spec((1, E)),                      # b2
            ],
            out_specs=pl.BlockSpec((tile, E), lambda i: (i, 0)),
            scratch_shapes=scratch_shapes,
        ),
        compiler_params=pltpu.CompilerParams(
            dimension_semantics=("parallel",),
            vmem_limit_bytes=_vmem_limit_bytes(),
        ),
        cost_estimate=cost,
    )(x2d, w1, b1_2d, w2, b2_2d)

    if rows_p != rows:
        out2d = out2d[:rows]
    return out2d.reshape(B, S, E)


def init_mlp_params(key, embedding_dim, mlp_dim, dtype=jnp.float32):
    """Deterministic init mimicking torch.nn.Linear defaults:
    U(-1/sqrt(fan_in), 1/sqrt(fan_in)) for both weight and bias."""
    k1, k2, k3, k4 = jax.random.split(key, 4)
    bound1 = 1.0 / math.sqrt(embedding_dim)
    bound2 = 1.0 / math.sqrt(mlp_dim)
    w1 = jax.random.uniform(k1, (embedding_dim, mlp_dim), dtype,
                            minval=-bound1, maxval=bound1)
    b1 = jax.random.uniform(k2, (mlp_dim,), dtype,
                            minval=-bound1, maxval=bound1)
    w2 = jax.random.uniform(k3, (mlp_dim, embedding_dim), dtype,
                            minval=-bound2, maxval=bound2)
    b2 = jax.random.uniform(k4, (embedding_dim,), dtype,
                            minval=-bound2, maxval=bound2)
    return w1, b1, w2, b2


def _reference(x, w1, b1, w2, b2):
    B, S, E = x.shape
    xf = x.astype(jnp.float32).reshape(-1, E)
    h = _gelu_exact_f32(xf @ w1.astype(jnp.float32) + b1.astype(jnp.float32))
    y = h @ w2.astype(jnp.float32) + b2.astype(jnp.float32)
    return y.reshape(B, S, E)


if __name__ == "__main__":
    key = jax.random.PRNGKey(0)

    # ---- Test 1: small ViT-like MLP block, f32, single-chunk path. ----
    B, S, E, M = 2, 8, 32, 64
    k_x, k_p = jax.random.split(key)
    x = jax.random.normal(k_x, (B, S, E), jnp.float32)
    w1, b1, w2, b2 = init_mlp_params(k_p, E, M)

    out = mlp_forward(x, w1, b1, w2, b2)
    jax.block_until_ready(out)
    ref = _reference(x, w1, b1, w2, b2)
    assert jnp.allclose(out, ref, atol=1e-5, rtol=1e-5), "mismatch vs reference"

    # ---- Test 2: ragged token count (B*S not a tile multiple). ----
    x_ragged = jax.random.normal(k_x, (B, 7, E), jnp.float32)
    out_r = mlp_forward(x_ragged, w1, b1, w2, b2)
    jax.block_until_ready(out_r)
    ref_r = _reference(x_ragged, w1, b1, w2, b2)
    assert jnp.allclose(out_r, ref_r, atol=1e-5, rtol=1e-5), "ragged mismatch"

    # ---- Test 3: hidden-dim chunked path (M > chunk), f32. ----
    E3, M3 = 128, 1024
    k_x3, k_p3 = jax.random.split(jax.random.PRNGKey(1))
    x3 = jax.random.normal(k_x3, (2, 8, E3), jnp.float32)
    w1_3, b1_3, w2_3, b2_3 = init_mlp_params(k_p3, E3, M3)
    out3 = mlp_forward(x3, w1_3, b1_3, w2_3, b2_3)
    jax.block_until_ready(out3)
    ref3 = _reference(x3, w1_3, b1_3, w2_3, b2_3)
    assert jnp.allclose(out3, ref3, atol=2e-3, rtol=2e-3), "chunked mismatch"

    # ---- Test 4: bf16 fast path (native-dtype MXU feed). ----
    E4, M4 = 128, 256
    k_x4, k_p4 = jax.random.split(jax.random.PRNGKey(2))
    x4 = jax.random.normal(k_x4, (2, 16, E4), jnp.bfloat16)
    w1_4, b1_4, w2_4, b2_4 = init_mlp_params(k_p4, E4, M4, dtype=jnp.bfloat16)
    out4 = mlp_forward(x4, w1_4, b1_4, w2_4, b2_4)
    jax.block_until_ready(out4)
    ref4 = _reference(x4, w1_4, b1_4, w2_4, b2_4)
    assert jnp.allclose(out4.astype(jnp.float32), ref4, atol=5e-2, rtol=5e-2), \
        "bf16 mismatch"

    print("KERNEL_OK")
</pallas_src>

<mosaic_0001>
module attributes {stable_mosaic.version = 11 : i64} {
  func.func @mlp_kernel(%arg0: i32, %arg1: memref<8x32xf32, #tpu.memory_space<vmem>>, %arg2: memref<32x64xf32, #tpu.memory_space<vmem>>, %arg3: memref<1x64xf32, #tpu.memory_space<vmem>>, %arg4: memref<64x32xf32, #tpu.memory_space<vmem>>, %arg5: memref<1x32xf32, #tpu.memory_space<vmem>>, %arg6: memref<8x32xf32, #tpu.memory_space<vmem>>) attributes {dimension_semantics = [#tpu.dimension_semantics<parallel>], iteration_bounds = array<i64: 2>, scalar_prefetch = 0 : i64, scratch_operands = 0 : i64, tpu.core_type = #tpu.core_type<tc>, window_params = [{transform_indices = @transform_0, window_bounds = array<i64: 8, 32>}, {pipeline_mode = #tpu.pipeline_mode<synchronous>, transform_indices = @transform_1, window_bounds = array<i64: 32, 64>}, {pipeline_mode = #tpu.pipeline_mode<synchronous>, transform_indices = @transform_2, window_bounds = array<i64: 1, 64>}, {pipeline_mode = #tpu.pipeline_mode<synchronous>, transform_indices = @transform_3, window_bounds = array<i64: 64, 32>}, {pipeline_mode = #tpu.pipeline_mode<synchronous>, transform_indices = @transform_4, window_bounds = array<i64: 1, 32>}, {transform_indices = @transform_5, window_bounds = array<i64: 8, 32>}]} {
    %c0 = arith.constant 0 : index
    %c0_0 = arith.constant 0 : index
    %0 = vector.load %arg1[%c0, %c0_0] : memref<8x32xf32, #tpu.memory_space<vmem>>, vector<8x32xf32>
    %c0_1 = arith.constant 0 : index
    %c0_2 = arith.constant 0 : index
    %1 = vector.load %arg5[%c0_1, %c0_2] : memref<1x32xf32, #tpu.memory_space<vmem>>, vector<1x32xf32>
    %c0_3 = arith.constant 0 : index
    %c0_4 = arith.constant 0 : index
    %2 = vector.load %arg2[%c0_3, %c0_4] : memref<32x64xf32, #tpu.memory_space<vmem>>, vector<32x64xf32>
    %cst = arith.constant dense<0.000000e+00> : vector<8x64xf32>
    %3 = tpu.matmul %0, %2, %cst {dimension_numbers = #tpu.dot_dimension_numbers<[1], [0], [0], [1], [0, 0, 1, 1], [], []>} : vector<8x32xf32>, vector<32x64xf32>, vector<8x64xf32> -> vector<8x64xf32>
    %c0_5 = arith.constant 0 : index
    %c0_6 = arith.constant 0 : index
    %4 = vector.load %arg3[%c0_5, %c0_6] : memref<1x64xf32, #tpu.memory_space<vmem>>, vector<1x64xf32>
    %5 = vector.broadcast %4 : vector<1x64xf32> to vector<8x64xf32>
    %6 = arith.addf %3, %5 : vector<8x64xf32>
    %cst_7 = arith.constant 5.000000e-01 : f32
    %7 = vector.broadcast %cst_7 : f32 to vector<8x64xf32>
    %8 = arith.mulf %7, %6 : vector<8x64xf32>
    %cst_8 = arith.constant 0.707106769 : f32
    %9 = vector.broadcast %cst_8 : f32 to vector<8x64xf32>
    %10 = arith.mulf %6, %9 : vector<8x64xf32>
    %11 = math.erf %10 : vector<8x64xf32>
    %cst_9 = arith.constant 1.000000e+00 : f32
    %12 = vector.broadcast %cst_9 : f32 to vector<8x64xf32>
    %13 = arith.addf %12, %11 : vector<8x64xf32>
    %14 = arith.mulf %8, %13 : vector<8x64xf32>
    %c0_10 = arith.constant 0 : index
    %c0_11 = arith.constant 0 : index
    %15 = vector.load %arg4[%c0_10, %c0_11] : memref<64x32xf32, #tpu.memory_space<vmem>>, vector<64x32xf32>
    %cst_12 = arith.constant dense<0.000000e+00> : vector<8x32xf32>
    %16 = tpu.matmul %14, %15, %cst_12 {dimension_numbers = #tpu.dot_dimension_numbers<[1], [0], [0], [1], [0, 0, 1, 1], [], []>} : vector<8x64xf32>, vector<64x32xf32>, vector<8x32xf32> -> vector<8x32xf32>
    %17 = vector.broadcast %1 : vector<1x32xf32> to vector<8x32xf32>
    %18 = arith.addf %16, %17 : vector<8x32xf32>
    %c0_13 = arith.constant 0 : index
    %c0_14 = arith.constant 0 : index
    %19 = vector.load %arg6[%c0_13, %c0_14] : memref<8x32xf32, #tpu.memory_space<vmem>>, vector<8x32xf32>
    tpu.vector_store %arg6[%c0_13, %c0_14], %18 {strides = array<i32>} : memref<8x32xf32, #tpu.memory_space<vmem>>, vector<8x32xf32>,
    return
  }
  func.func @transform_0(%arg0: i32) -> (i32, i32) {
    %c0_i32 = arith.constant 0 : i32
    %c0_i32_0 = arith.constant 0 : i32
    return %arg0, %c0_i32 : i32, i32
  }
  func.func @transform_1(%arg0: i32) -> (i32, i32) {
    %c0_i32 = arith.constant 0 : i32
    %c0_i32_0 = arith.constant 0 : i32
    %c0_i32_1 = arith.constant 0 : i32
    return %c0_i32, %c0_i32_0 : i32, i32
  }
  func.func @transform_2(%arg0: i32) -> (i32, i32) {
    %c0_i32 = arith.constant 0 : i32
    %c0_i32_0 = arith.constant 0 : i32
    %c0_i32_1 = arith.constant 0 : i32
    return %c0_i32, %c0_i32_0 : i32, i32
  }
  func.func @transform_3(%arg0: i32) -> (i32, i32) {
    %c0_i32 = arith.constant 0 : i32
    %c0_i32_0 = arith.constant 0 : i32
    %c0_i32_1 = arith.constant 0 : i32
    return %c0_i32, %c0_i32_0 : i32, i32
  }
  func.func @transform_4(%arg0: i32) -> (i32, i32) {
    %c0_i32 = arith.constant 0 : i32
    %c0_i32_0 = arith.constant 0 : i32
    %c0_i32_1 = arith.constant 0 : i32
    return %c0_i32, %c0_i32_0 : i32, i32
  }
  func.func @transform_5(%arg0: i32) -> (i32, i32) {
    %c0_i32 = arith.constant 0 : i32
    %c0_i32_0 = arith.constant 0 : i32
    return %arg0, %c0_i32 : i32, i32
  }
}

</mosaic_0001>

<bundles_post_ra>
// kernel: mlp_forward.1
= control target key start
LH: loop header
LB: loop body
LE: loop exit
PB: predicated region body
PF: predicated region fallthrough
CT: control target
= control target key end

     0   :  { %10 = vsyncpa [#allocation3], 0  ;;  %s807_s0 = inlined_call_operand.vmem [shape: f32[16,32], index: 0, kind: input, shape index: {}]   ;;  %s808_s1 = inlined_call_operand.vmem [shape: f32[32,64], index: 1, kind: input, shape index: {}]   ;;  %s809_s2 = inlined_call_operand.vmem [shape: f32[1,64], index: 2, kind: input, shape index: {}]   ;;  %s810_s3 = inlined_call_operand.vmem [shape: f32[64,32], index: 3, kind: input, shape index: {}]   ;;  %s811_s4 = inlined_call_operand.vmem [shape: f32[1,32], index: 4, kind: input, shape index: {}]   ;;  %s812_s5 = inlined_call_operand.hbm [shape: f32[16,32], index: 5, kind: output, shape index: {}]  }
   0x1   :  { %12 = vsyncpa [#allocation3 + $0x1], 0  ;;  %s670_s18 = smov 0   ;;  %s672_s19 = smov 0  }
   0x2   :  { %s674_s20 = smov 0   ;;  %s676_s21 = smov 0  }
   0x3 LB: > { %s691_s22 = sadd.s32 4294967295, %s635_s21   ;;  %s474_s23 = sadd.s32 4294967294, %s635_s21   ;;  %s635_s21 = sphi %s676_s21, %s818_s21   ;;  %s631_s20 = sphi %s674_s20, %s817_s20   ;;  %s627_s19 = sphi %s672_s19, %s816_s19   ;;  %s623_s18 = sphi %s670_s18, %s815_s18  }
   0x4   : > { %s695_s24 = sadd.s32 1, %s635_s21   ;;  %s135_s25 = sadd.s32 1, %s631_s20 }
   0x5   : > { %s132_s26 = ssub.s32 %s635_s21, %s695_s24  ;;  %p145_p0 = scmp.ne.s32.totalorder %s631_s20, %s627_s19 }
   0x6   : > { %p133_p1 = scmp.eq.s32.totalorder %s132_s26, 0  ;;  %p146_p2 = scmp.eq.s32.totalorder %s691_s22, 1 }
   0x7   : > { %p151_p3 = scmp.ne.s32.totalorder %s627_s19, %s623_s18  ;;  %p152_p4 = scmp.eq.s32.totalorder %s474_s23, 1 }
   0x8   : > { %s706_s27 = scalar_select %p133_p1, %s631_s20, %s135_s25  }
   0x9   : > { %p708_p5 = por %p146_p2, %p145_p0  ;;  %p712_p6 = por %p152_p4, %p151_p3 }
   0xa   : > { %p477_p7 = scmp.ge.s32.totalorder %s635_s21, 1  ;;  %p189_p8 = scmp.lt.s32.totalorder %s635_s21, 3 }
   0xc   : > { %p190_p9 = pnand %p477_p7, %p189_p8 }
   0xd   : > { %p216_p10 = scmp.lt.s32.totalorder (!%p190_p9), %s691_s22, 1  ;;  %s213_s26 = sand.u32 (!%p190_p9), 1, %s627_s19  }
   0xe   : > { %193 = sbr.rel (%p190_p9) target bundleno = 451 (0x1c3), region = 40  ;;  %s478_s30 = sshll.u32 (!%p190_p9), %s213_s26, 3 }
   0xf   : > { %s485_s8 = sshll.u32 (!%p190_p9), %s691_s22, 7  ;;  %s402_s14 = scalar_lea.sflag (!%p190_p9), [#allocation3], %s213_s26 }
  0x10   : > { %s771_s13 = scalar_lea.hbm (!%p190_p9), %s812_s5, %s485_s8 }
  0x13   : > { %v225_v0 = vld [vmem:[%s808_s1 + $0x18] sm:$0xff]  ;;  %v637_v1 = vmov 0.0   ;;  %v224_v2 = vld [vmem:[%s808_s1 + $0x10] sm:$0xff]  ;;  %vm638_vm0 = vmmov 0   ;;  %s217_s9 = scalar_select %p216_p10, %s691_s22, 1  ;;  %v223_v3 = vld [vmem:[%s808_s1 + $0x8] sm:$0xff] }
  0x14   : > { %502 = vmatprep.subr.mxu0 %v637_v1  ;;  %510 = vmatprep.mubr.msk.f32.mxu0 %vm638_vm0, %v637_v1  ;;  %v222_v4 = vld [vmem:[%s808_s1] sm:$0xff]  ;;  %vm233_vm1 = vcmask 261120   ;;  %v319_v6 = vld [vmem:[%s810_s3 + $0x38] sm:$0xff]  ;;  %v318_v7 = vld [vmem:[%s810_s3 + $0x30] sm:$0xff]  ;;  %vm326_vm2 = vcmask 523264   ;;  %s639_s22 = smov [#allocation2]  }
  0x15   : > { %503 = vmatpush3.msra.mxu0 %v225_v0  ;;  %513 = vmatprep.subr.mxu1 %v637_v1  ;;  %s479_s12 = sshll.u32 %s217_s9, 3  ;;  %v317_v8 = vld [vmem:[%s810_s3 + $0x28] sm:$0xff]  ;;  %v316_v9 = vld [vmem:[%s810_s3 + $0x20] sm:$0xff]  ;;  %v315_v10 = vld [vmem:[%s810_s3 + $0x18] sm:$0xff]  ;;  %s215_s9 = scalar_lea.vmem [#allocation2], %s478_s30 }
  0x16   : > { %504 = vmatprep.subr.mxu0 %v637_v1  ;;  %529 = vmatprep.mubr.msk.f32.mxu1 %vm638_vm0, %v637_v1  ;;  %s219_s17 = scalar_lea.vmem %s807_s0, %s479_s12  ;;  %v314_v11 = vld [vmem:[%s810_s3 + $0x10] sm:$0xff]  ;;  %v313_v12 = vld [vmem:[%s810_s3 + $0x8] sm:$0xff]  ;;  %v312_v13 = vld [vmem:[%s810_s3] sm:$0xff]  ;;  %s415_s10 = sshll.u32 %s215_s9, 4  ;;  %s416_s10 = int_to_ptr.vmem [resolvable:$true] %s415_s10 }
  0x17   : > { %505 = vmatpush3.msra.mxu0 %v224_v2  ;;  %v220_v5 = vld [vmem:[%s219_s17] sm:$0xff]  ;;  %514 = vmatpush3.msra.mxu1 %v319_v6  ;;  %s575_s15 = scalar_lea.vmem %s416_s10, 128  ;;  %s579_s16 = sshll.u32 %s639_s22, 4  ;;  %s580_s16 = int_to_ptr.vmem [resolvable:$false] %s579_s16 }
  0x18   : > { %506 = vmatprep.subr.mxu0 %v637_v1  ;;  %515 = vmatprep.subr.mxu1 %v637_v1  ;;  %v480_v14 = vld [vmem:[%s809_s2] ss:$0 sm:$0xff]  ;;  %p576_p11 = scmp.ne.s32.totalorder %s416_s10, %s575_s15  ;;  %s581_s17 = scalar_lea.vmem %s580_s16, 256 }
  0x19   : > { %507 = vmatpush3.msra.mxu0 %v223_v3  ;;  %516 = vmatpush3.msra.mxu1 %v318_v7  ;;  %v482_v23 = vld [vmem:[%s811_s4] ss:$0 sm:$0xff]  ;;  %p582_p0 = scmp.lt.s32.totalorder %s416_s10, %s580_s16  ;;  %p583_p1 = scmp.lt.s32.totalorder %s581_s17, %s575_s15 }
  0x1a   : > { %508 = vmatprep.subr.mxu0 %v637_v1  ;;  %517 = vmatprep.subr.mxu1 %v637_v1  ;;  %p577_p12 = pnand %p576_p11, %p708_p5 }
  0x1b   : > { %509 = vmatpush3.msra.mxu0 %v222_v4  ;;  %518 = vmatpush3.msra.mxu1 %v317_v8  ;;  %p584_p2 = por %p583_p1, %p582_p0 }
  0x1c   : > { %511 = vmatmul.mubr.msk.f32.vlgmr.msra.gmra.mxu0 %vm233_vm1, %v220_v5  ;;  %519 = vmatprep.subr.mxu1 %v637_v1  ;;  %p578_p13 = pneg %p577_p12 }
  0x1d   : > { %520 = vmatpush3.msra.mxu1 %v316_v9 }
  0x1e   : > { %521 = vmatprep.subr.mxu1 %v637_v1  ;;  %p585_p3 = pnand %p584_p2, %p578_p13 }
  0x1f   : > { %522 = vmatpush3.msra.mxu1 %v315_v10 }
  0x20   : > { %523 = vmatprep.subr.mxu1 %v637_v1 }
  0x21   : > { %524 = vmatpush3.msra.mxu1 %v314_v11 }
  0x22   : > { %525 = vmatprep.subr.mxu1 %v637_v1 }
  0x23   : > { %526 = vmatpush3.msra.mxu1 %v313_v12 }
  0x24   : > { %527 = vmatprep.subr.mxu1 %v637_v1 }
  0x25   : > { %528 = vmatpush3.msra.mxu1 %v312_v13 }
  0xdc   : > { %v303_v15 = vpop.f32.mrf.mxu0 }
  0xdd   : > { %v304_v16 = vadd.f32 %v480_v14, %v303_v15 }
  0xde   : > { %v512_v17 = vpop.f32.mrf.mxu0 }
  0xdf   : > { %v308_v18 = vmul.f32 0.70710677, %v304_v16  ;;  %v307_v20 = vmul.f32 0.5, %v304_v16 }
  0xe1   : > { %573 = verf.f32 %v308_v18 }
  0xee   : > { %v574_v19 = vpop.eup %573 }
  0xef   : > { %v310_v21 = vadd.f32 1.0, %v574_v19 }
  0xf1   : > { %v311_v22 = vmul.f32 %v310_v21, %v307_v20 }
  0xf3   : > { %530 = vmatmul.mubr.msk.f32.vlgmr.msra.gmra.mxu1 %vm326_vm2, %v311_v22 }
 0x1b3   : > { %v396_v24 = vpop.f32.mrf.mxu1 }
 0x1b4   : > { %v397_v25 = vadd.f32 %v482_v23, %v396_v24 }
 0x1b5   : > { %v531_v26 = vpop.f32.mrf.mxu1 }
 0x1b6   : > { %400 = vst.msk [vmem:[%s215_s9] sm:$0xff] %vm233_vm1, %v397_v25 }
 0x1b7   : > { %588 = shalt.err (!%p585_p3)
}
 0x1b8   : > { %s589_s23 = scalar_lea.hbm %s771_s13, 128  ;;  %s593_s30 = scalar_lea.hbm %s812_s5, 256 }
 0x1b9   : > { %p590_p4 = scmp.ne.s32.totalorder %s771_s13, %s589_s23  ;;  %p594_p9 = scmp.lt.s32.totalorder %s771_s13, %s812_s5 }
 0x1ba   : > { %p595_p10 = scmp.lt.s32.totalorder %s593_s30, %s589_s23 }
 0x1bb   : > { %p591_p7 = pnand %p590_p4, %p708_p5 }
 0x1bc   : > { %p596_p11 = por %p595_p10, %p594_p9 }
 0x1bd   : > { %p592_p8 = pneg %p591_p7 }
 0x1bf   : > { %p597_p12 = pnand %p596_p11, %p592_p8 }
 0x1c1   : > { %600 = shalt.err (!%p597_p12)
}
 0x1c2   : > { %532 = dma.vmem_to_hbm [thread:$0]  (%p708_p5), %s416_s10, 128, %s771_s13, %s402_s14  }
 0x1c3 PF: > { %p538_p13 = scmp.ge.s32.totalorder %s635_s21, 2  ;;  %s427_s8 = sand.u32 1, %s623_s18  }
 0x1c4   : > { %s428_s9 = scalar_lea.sflag [#allocation3], %s427_s8 }
 0x1c5   : > { %p535_p0 = pnand %p538_p13, %p712_p6 }
 0x1c7   : > { %p536_p1 = pneg %p535_p0 }
 0x1c9   : > { %618 = dma.done.wait (%p536_p1), %s428_s9, 128  }
 0x1ca   : > { %620 = vsyncadd (%p536_p1), %s428_s9, 4294967168  ;;  %p15_p2 = scmp.ge.s32.totalorder %s695_s24, 4   ;;  %s815_s18 = smov %s627_s19 }
 0x1cb   : > { %s816_s19 = smov %s631_s20  ;;  %s817_s20 = smov %s706_s27 }
 0x1cc   : > { %s818_s21 = smov %s695_s24  ;;  %17 = sbr.rel (!%p15_p2) target bundleno = 3 (0x3), region = 75 }
 0x1d1   :  { %433 = vsyncpa [#allocation3], 1 }
 0x1d2   :  { %435 = vsyncpa [#allocation3 + $0x1], 1 }

</bundles_post_ra>
